<compile_context>
chip_gen: v5e
topology: v5e:2x2
jax: 0.10.0
libtpu: 0.0.40
codegen_flags: <defaults>
</compile_context>

<pallas_src>
import functools

import jax
import jax.numpy as jnp
from jax import lax
from jax.experimental import pallas as pl
from jax.experimental.pallas import tpu as pltpu


# ---------------------------- single-pass kernel ----------------------------

def _fusion_kernel(x_ref, y_ref, w1t_ref, b1_ref, w2t_ref, b2_ref, o_ref, *, inv_hw):
    x = x_ref[...]                                     # (Bt, C, HW), input dtype
    y = y_ref[...]

    # AdaptiveAvgPool2d((1,1)) of z = x + y, accumulated in f32 (z not materialized).
    pooled = (jnp.sum(x, axis=-1, dtype=jnp.float32) +
              jnp.sum(y, axis=-1, dtype=jnp.float32)) * inv_hw       # (Bt, C) f32

    # Conv2d(C, C//r, 1) + ReLU  ==  pooled @ W1^T + b1
    h = jnp.dot(pooled, w1t_ref[...], preferred_element_type=jnp.float32)
    h = jnp.maximum(h + b1_ref[...], 0.0)                            # (Bt, Cr)

    # Conv2d(C//r, C, 1) + Sigmoid  ==  h @ W2^T + b2
    s = jnp.dot(h, w2t_ref[...], preferred_element_type=jnp.float32)
    s = jax.nn.sigmoid(s + b2_ref[...])[:, :, None]                  # (Bt, C, 1) f32

    # out = x*s + y*(1-s) == y + (x - y)*s ; gate stays f32, cast only the result.
    o_ref[...] = (y + (x - y) * s).astype(o_ref.dtype)


# --------------------------- two-pass fallback kernels -----------------------

def _pool_kernel(x_ref, y_ref, pooled_ref, acc_ref, *, inv_hw, hw, t_hw, mask_tail):
    h = pl.program_id(1)

    @pl.when(h == 0)
    def _():
        acc_ref[...] = jnp.zeros_like(acc_ref)

    zs = x_ref[...].astype(jnp.float32) + y_ref[...].astype(jnp.float32)  # (1,C,t_hw)
    if mask_tail:
        col = h * t_hw + lax.broadcasted_iota(jnp.int32, zs.shape, 2)
        zs = jnp.where(col < hw, zs, 0.0)
    acc_ref[...] += jnp.sum(zs, axis=-1)                                  # (1, C)

    @pl.when(h == pl.num_programs(1) - 1)
    def _():
        pooled_ref[...] = (acc_ref[...] * inv_hw)[:, None, :]             # (1, 1, C)


def _apply_kernel(s_ref, x_ref, y_ref, o_ref):
    x = x_ref[...]                      # (1, C, t_hw)
    y = y_ref[...]
    s = s_ref[...]                      # (1, C, 1) f32, per-channel gate
    o_ref[...] = (y + (x - y) * s).astype(o_ref.dtype)


# --------------------------------- wrappers ----------------------------------

def _vmem_budgets():
    """Generation-aware (tile_budget, vmem_limit_ceiling) in bytes."""
    try:
        cap = int(pltpu.get_tpu_info().vmem_capacity_bytes)
    except Exception:
        cap = 0
    if not cap:
        cap = 64 << 20                      # conservative: fits every generation
    tile_budget = int(cap * 0.65)           # space for the double-buffered tiles
    vmem_ceiling = int(min(cap * 0.85, cap - (8 << 20)))   # leave compiler headroom
    return tile_budget, vmem_ceiling


def _feature_fusion_two_pass(xf, yf, w1t, b1r, w2t, b2r, *, tile_budget, vmem_ceiling):
    """Pool pass + JAX gate + gate-apply pass, each tiled over HW."""
    B, C, HW = xf.shape
    itemsize = xf.dtype.itemsize

    # HW tile: multiple of 128, sized so 6 double-buffered (1, C, t_hw) tiles fit.
    t_hw = (tile_budget // (6 * C * itemsize)) // 128 * 128
    t_hw = max(128, t_hw)
    if t_hw >= HW:
        t_hw = HW
    n_hw = pl.cdiv(HW, t_hw)
    mask_tail = (HW % t_hw) != 0

    # ---- pass 1: pooled = mean_hw(x + y)  ->  (B, 1, C) f32 ----
    pool_kernel = functools.partial(_pool_kernel, inv_hw=1.0 / HW, hw=HW,
                                    t_hw=t_hw, mask_tail=mask_tail)
    vmem_p1 = int(min(max(4 * C * t_hw * itemsize + (4 << 20), 32 << 20), vmem_ceiling))
    pooled = pl.pallas_call(
        pool_kernel,
        out_shape=jax.ShapeDtypeStruct((B, 1, C), jnp.float32),
        grid=(B, n_hw),
        in_specs=[
            pl.BlockSpec((1, C, t_hw), lambda b, h: (b, 0, h)),   # x
            pl.BlockSpec((1, C, t_hw), lambda b, h: (b, 0, h)),   # y
        ],
        out_specs=pl.BlockSpec((1, 1, C), lambda b, h: (b, 0, 0)),
        scratch_shapes=[pltpu.VMEM((1, C), jnp.float32)],
        compiler_params=pltpu.CompilerParams(
            dimension_semantics=("parallel", "arbitrary"),
            vmem_limit_bytes=vmem_p1,
        ),
    )(xf, yf)

    # ---- tiny SE gate in plain JAX (B x C problem, negligible) ----
    p = pooled.reshape(B, C)
    hcr = jnp.maximum(jnp.dot(p, w1t, preferred_element_type=jnp.float32) + b1r, 0.0)
    s = jax.nn.sigmoid(jnp.dot(hcr, w2t, preferred_element_type=jnp.float32) + b2r)
    s3 = s.reshape(B, C, 1)

    # ---- pass 2: out = y + (x - y) * s, tiled over (B, HW) ----
    vmem_p2 = int(min(max(6 * C * t_hw * itemsize + (4 << 20), 32 << 20), vmem_ceiling))
    out = pl.pallas_call(
        _apply_kernel,
        out_shape=jax.ShapeDtypeStruct((B, C, HW), xf.dtype),
        grid=(B, n_hw),
        in_specs=[
            pl.BlockSpec((1, C, 1), lambda b, h: (b, 0, 0)),      # gate (resident per b)
            pl.BlockSpec((1, C, t_hw), lambda b, h: (b, 0, h)),   # x
            pl.BlockSpec((1, C, t_hw), lambda b, h: (b, 0, h)),   # y
        ],
        out_specs=pl.BlockSpec((1, C, t_hw), lambda b, h: (b, 0, h)),
        compiler_params=pltpu.CompilerParams(
            dimension_semantics=("parallel", "parallel"),
            vmem_limit_bytes=vmem_p2,
        ),
    )(s3, xf, yf)
    return out


def feature_fusion(x, y, w1, b1, w2, b2, *, force_two_pass=False, tile_budget=None):
    """x, y: (B, C, H, W).  w1: (C//r, C), b1: (C//r, 1), w2: (C, C//r), b2: (C, 1)."""
    B, C, H, W = x.shape
    HW = H * W
    Cr = w1.shape[0]

    # Keep inputs/outputs in their HBM dtype end-to-end (no wrapper upcasts).
    xf = x.reshape(B, C, HW)
    yf = y.reshape(B, C, HW)

    # Pre-transposed weights / row biases so the kernel needs no transposes.
    w1t = jnp.asarray(w1, jnp.float32).T.reshape(C, Cr)
    w2t = jnp.asarray(w2, jnp.float32).T.reshape(Cr, C)
    b1r = jnp.asarray(b1, jnp.float32).reshape(1, Cr)
    b2r = jnp.asarray(b2, jnp.float32).reshape(1, C)

    auto_budget, vmem_ceiling = _vmem_budgets()
    if tile_budget is None:
        tile_budget = auto_budget

    itemsize = xf.dtype.itemsize
    row_bytes = 6 * C * HW * itemsize     # x, y, out, double-buffered, per batch row

    if force_two_pass or row_bytes > tile_budget:
        out = _feature_fusion_two_pass(xf, yf, w1t, b1r, w2t, b2r,
                                       tile_budget=tile_budget,
                                       vmem_ceiling=vmem_ceiling)
        return out.reshape(B, C, H, W)

    # ---- single-pass path: choose the batch tile Bt ----
    bt = max(1, min(B, tile_budget // row_bytes))     # largest that fits VMEM
    if B >= 2:
        bt = min(bt, max(1, B // 2))                  # >= 2 grid steps: v7x megacore
    # Prefer >= 4 grid steps for pipeline overlap, but keep tiles >= ~2 MiB.
    min_tile_rows = max(1, -(-(2 << 20) // row_bytes))
    bt = min(bt, max(B // 4, min_tile_rows, 1))
    bt = max(1, min(bt, B))

    grid = (pl.cdiv(B, bt),)                          # ragged tail: writes are clipped

    param_bytes = 4 * (2 * C * Cr + C + Cr)
    vmem_needed = bt * row_bytes + 2 * param_bytes + (2 << 20)
    vmem_limit = int(min(max(vmem_needed, 32 << 20), vmem_ceiling))

    kernel = functools.partial(_fusion_kernel, inv_hw=1.0 / HW)

    out = pl.pallas_call(
        kernel,
        out_shape=jax.ShapeDtypeStruct((B, C, HW), x.dtype),
        grid=grid,
        in_specs=[
            pl.BlockSpec((bt, C, HW), lambda b: (b, 0, 0)),   # x
            pl.BlockSpec((bt, C, HW), lambda b: (b, 0, 0)),   # y
            pl.BlockSpec((C, Cr), lambda b: (0, 0)),          # W1^T (resident)
            pl.BlockSpec((1, Cr), lambda b: (0, 0)),          # b1 row
            pl.BlockSpec((Cr, C), lambda b: (0, 0)),          # W2^T (resident)
            pl.BlockSpec((1, C), lambda b: (0, 0)),           # b2 row
        ],
        out_specs=pl.BlockSpec((bt, C, HW), lambda b: (b, 0, 0)),
        compiler_params=pltpu.CompilerParams(
            dimension_semantics=("parallel",),
            vmem_limit_bytes=vmem_limit,
        ),
    )(xf, yf, w1t, b1r, w2t, b2r)

    return out.reshape(B, C, H, W)


def feature_fusion_ref(x, y, w1, b1, w2, b2):
    """Pure-JAX reference mirroring the PyTorch forward."""
    B, C, H, W = x.shape
    Cr = w1.shape[0]
    z = x + y
    pooled = jnp.mean(z, axis=(2, 3), keepdims=True)                 # (B, C, 1, 1)
    h = jnp.einsum('oc,bcij->boij', w1, pooled) + b1.reshape(1, Cr, 1, 1)
    h = jnp.maximum(h, 0.0)
    s = jnp.einsum('co,boij->bcij', w2, h) + b2.reshape(1, C, 1, 1)
    s = jax.nn.sigmoid(s)
    return x * s + y * (1 - s)


if __name__ == "__main__":
    key = jax.random.PRNGKey(0)

    def make_case(k, B, C, H, W, r=4):
        Cr = max(C // r, 1)
        k1, k2, k3, k4, k5, k6 = jax.random.split(k, 6)
        x = jax.random.normal(k1, (B, C, H, W), jnp.float32)
        y = jax.random.normal(k2, (B, C, H, W), jnp.float32)
        w1 = 0.5 * jax.random.normal(k3, (Cr, C), jnp.float32)
        b1 = 0.1 * jax.random.normal(k4, (Cr, 1), jnp.float32)
        w2 = 0.5 * jax.random.normal(k5, (C, Cr), jnp.float32)
        b2 = 0.1 * jax.random.normal(k6, (C, 1), jnp.float32)
        return x, y, w1, b1, w2, b2

    k1, k2, k3 = jax.random.split(key, 3)

    # Case 1: module-sized case (lane-aligned HW, even batch) -> single-pass path.
    args = make_case(k1, B=2, C=4, H=16, W=16)
    out = jax.block_until_ready(feature_fusion(*args))
    ref = feature_fusion_ref(*args)
    assert out.shape == args[0].shape and out.dtype == args[0].dtype
    assert jnp.allclose(out, ref, atol=1e-5, rtol=1e-5), float(jnp.max(jnp.abs(out - ref)))

    # Case 2: non-128-multiple spatial map (7x7) + ragged batch (B=5, Bt=2).
    args2 = make_case(k2, B=5, C=8, H=7, W=7)
    out2 = jax.block_until_ready(feature_fusion(*args2))
    ref2 = feature_fusion_ref(*args2)
    assert jnp.allclose(out2, ref2, atol=1e-5, rtol=1e-5), float(jnp.max(jnp.abs(out2 - ref2)))

    # Case 3: force the two-pass fallback (pool + gate-apply) with several ragged
    # HW tiles, as used when one batch row exceeds the VMEM budget.
    args3 = make_case(k3, B=2, C=8, H=20, W=20)
    small_budget = 6 * 8 * 128 * 4                     # -> t_hw = 128 over HW = 400
    out3 = jax.block_until_ready(
        feature_fusion(*args3, force_two_pass=True, tile_budget=small_budget))
    ref3 = feature_fusion_ref(*args3)
    assert jnp.allclose(out3, ref3, atol=1e-5, rtol=1e-5), float(jnp.max(jnp.abs(out3 - ref3)))

    print("KERNEL_OK")
</pallas_src>

<mosaic_0001>
module attributes {stable_mosaic.version = 11 : i64} {
  func.func @_fusion_kernel(%arg0: i32, %arg1: memref<1x4x256xf32, #tpu.memory_space<vmem>>, %arg2: memref<1x4x256xf32, #tpu.memory_space<vmem>>, %arg3: memref<4x1xf32, #tpu.memory_space<vmem>>, %arg4: memref<1x1xf32, #tpu.memory_space<vmem>>, %arg5: memref<1x4xf32, #tpu.memory_space<vmem>>, %arg6: memref<1x4xf32, #tpu.memory_space<vmem>>, %arg7: memref<1x4x256xf32, #tpu.memory_space<vmem>>) attributes {dimension_semantics = [#tpu.dimension_semantics<parallel>], iteration_bounds = array<i64: 2>, scalar_prefetch = 0 : i64, scratch_operands = 0 : i64, tpu.core_type = #tpu.core_type<tc>, window_params = [{transform_indices = @transform_0, window_bounds = array<i64: 1, 4, 256>}, {transform_indices = @transform_1, window_bounds = array<i64: 1, 4, 256>}, {pipeline_mode = #tpu.pipeline_mode<synchronous>, transform_indices = @transform_2, window_bounds = array<i64: 4, 1>}, {pipeline_mode = #tpu.pipeline_mode<synchronous>, transform_indices = @transform_3, window_bounds = array<i64: 1, 1>}, {pipeline_mode = #tpu.pipeline_mode<synchronous>, transform_indices = @transform_4, window_bounds = array<i64: 1, 4>}, {pipeline_mode = #tpu.pipeline_mode<synchronous>, transform_indices = @transform_5, window_bounds = array<i64: 1, 4>}, {transform_indices = @transform_6, window_bounds = array<i64: 1, 4, 256>}]} {
    %c0 = arith.constant 0 : index
    %c0_0 = arith.constant 0 : index
    %c0_1 = arith.constant 0 : index
    %0 = vector.load %arg1[%c0, %c0_0, %c0_1] : memref<1x4x256xf32, #tpu.memory_space<vmem>>, vector<1x4x256xf32>
    %c0_2 = arith.constant 0 : index
    %c0_3 = arith.constant 0 : index
    %c0_4 = arith.constant 0 : index
    %1 = vector.load %arg2[%c0_2, %c0_3, %c0_4] : memref<1x4x256xf32, #tpu.memory_space<vmem>>, vector<1x4x256xf32>
    %cst = arith.constant dense<0.000000e+00> : vector<1x4xf32>
    %2 = vector.multi_reduction <add>, %0, %cst [2] : vector<1x4x256xf32> to vector<1x4xf32>
    %cst_5 = arith.constant dense<0.000000e+00> : vector<1x4xf32>
    %3 = vector.multi_reduction <add>, %1, %cst_5 [2] : vector<1x4x256xf32> to vector<1x4xf32>
    %4 = arith.addf %2, %3 : vector<1x4xf32>
    %cst_6 = arith.constant 3.906250e-03 : f32
    %5 = vector.broadcast %cst_6 : f32 to vector<1x4xf32>
    %6 = arith.mulf %4, %5 : vector<1x4xf32>
    %c0_7 = arith.constant 0 : index
    %c0_8 = arith.constant 0 : index
    %7 = vector.load %arg3[%c0_7, %c0_8] : memref<4x1xf32, #tpu.memory_space<vmem>>, vector<4x1xf32>
    %cst_9 = arith.constant dense<0.000000e+00> : vector<1x1xf32>
    %8 = tpu.matmul %6, %7, %cst_9 {dimension_numbers = #tpu.dot_dimension_numbers<[1], [0], [0], [1], [0, 0, 1, 1], [], []>} : vector<1x4xf32>, vector<4x1xf32>, vector<1x1xf32> -> vector<1x1xf32>
    %c0_10 = arith.constant 0 : index
    %c0_11 = arith.constant 0 : index
    %9 = vector.load %arg4[%c0_10, %c0_11] : memref<1x1xf32, #tpu.memory_space<vmem>>, vector<1x1xf32>
    %10 = arith.addf %8, %9 : vector<1x1xf32>
    %cst_12 = arith.constant 0.000000e+00 : f32
    %11 = vector.broadcast %cst_12 : f32 to vector<1x1xf32>
    %12 = arith.maximumf %10, %11 : vector<1x1xf32>
    %c0_13 = arith.constant 0 : index
    %c0_14 = arith.constant 0 : index
    %13 = vector.load %arg5[%c0_13, %c0_14] : memref<1x4xf32, #tpu.memory_space<vmem>>, vector<1x4xf32>
    %cst_15 = arith.constant dense<0.000000e+00> : vector<1x4xf32>
    %14 = tpu.matmul %12, %13, %cst_15 {dimension_numbers = #tpu.dot_dimension_numbers<[1], [0], [0], [1], [0, 0, 1, 1], [], []>} : vector<1x1xf32>, vector<1x4xf32>, vector<1x4xf32> -> vector<1x4xf32>
    %c0_16 = arith.constant 0 : index
    %c0_17 = arith.constant 0 : index
    %15 = vector.load %arg6[%c0_16, %c0_17] : memref<1x4xf32, #tpu.memory_space<vmem>>, vector<1x4xf32>
    %16 = arith.addf %14, %15 : vector<1x4xf32>
    %17 = arith.negf %16 : vector<1x4xf32>
    %18 = math.exp %17 : vector<1x4xf32>
    %cst_18 = arith.constant 1.000000e+00 : f32
    %19 = vector.broadcast %cst_18 : f32 to vector<1x4xf32>
    %20 = arith.addf %19, %18 : vector<1x4xf32>
    %21 = arith.divf %19, %20 : vector<1x4xf32>
    %22 = vector.shape_cast %21 : vector<1x4xf32> to vector<1x4x1xf32>
    %23 = arith.subf %0, %1 : vector<1x4x256xf32>
    %24 = vector.broadcast %22 : vector<1x4x1xf32> to vector<1x4x256xf32>
    %25 = arith.mulf %23, %24 : vector<1x4x256xf32>
    %26 = arith.addf %1, %25 : vector<1x4x256xf32>
    %c0_19 = arith.constant 0 : index
    %c0_20 = arith.constant 0 : index
    %c0_21 = arith.constant 0 : index
    %27 = vector.load %arg7[%c0_19, %c0_20, %c0_21] : memref<1x4x256xf32, #tpu.memory_space<vmem>>, vector<1x4x256xf32>
    tpu.vector_store %arg7[%c0_19, %c0_20, %c0_21], %26 {strides = array<i32>} : memref<1x4x256xf32, #tpu.memory_space<vmem>>, vector<1x4x256xf32>,
    return
  }
  func.func @transform_0(%arg0: i32) -> (i32, i32, i32) {
    %c0_i32 = arith.constant 0 : i32
    %c0_i32_0 = arith.constant 0 : i32
    %c0_i32_1 = arith.constant 0 : i32
    return %arg0, %c0_i32, %c0_i32_0 : i32, i32, i32
  }
  func.func @transform_1(%arg0: i32) -> (i32, i32, i32) {
    %c0_i32 = arith.constant 0 : i32
    %c0_i32_0 = arith.constant 0 : i32
    %c0_i32_1 = arith.constant 0 : i32
    return %arg0, %c0_i32, %c0_i32_0 : i32, i32, i32
  }
  func.func @transform_2(%arg0: i32) -> (i32, i32) {
    %c0_i32 = arith.constant 0 : i32
    %c0_i32_0 = arith.constant 0 : i32
    %c0_i32_1 = arith.constant 0 : i32
    return %c0_i32, %c0_i32_0 : i32, i32
  }
  func.func @transform_3(%arg0: i32) -> (i32, i32) {
    %c0_i32 = arith.constant 0 : i32
    %c0_i32_0 = arith.constant 0 : i32
    %c0_i32_1 = arith.constant 0 : i32
    return %c0_i32, %c0_i32_0 : i32, i32
  }
  func.func @transform_4(%arg0: i32) -> (i32, i32) {
    %c0_i32 = arith.constant 0 : i32
    %c0_i32_0 = arith.constant 0 : i32
    %c0_i32_1 = arith.constant 0 : i32
    return %c0_i32, %c0_i32_0 : i32, i32
  }
  func.func @transform_5(%arg0: i32) -> (i32, i32) {
    %c0_i32 = arith.constant 0 : i32
    %c0_i32_0 = arith.constant 0 : i32
    %c0_i32_1 = arith.constant 0 : i32
    return %c0_i32, %c0_i32_0 : i32, i32
  }
  func.func @transform_6(%arg0: i32) -> (i32, i32, i32) {
    %c0_i32 = arith.constant 0 : i32
    %c0_i32_0 = arith.constant 0 : i32
    %c0_i32_1 = arith.constant 0 : i32
    return %arg0, %c0_i32, %c0_i32_0 : i32, i32, i32
  }
}

</mosaic_0001>

<bundles_post_ra>
// kernel: tpu_custom_call.1
= control target key start
LH: loop header
LB: loop body
LE: loop exit
PB: predicated region body
PF: predicated region fallthrough
CT: control target
= control target key end

     0   :  { %s986_s0 = inlined_call_operand.hbm [shape: f32[2,4,256], index: 0, kind: input, shape index: {}]   ;;  %s987_s1 = inlined_call_operand.hbm [shape: f32[2,4,256], index: 1, kind: input, shape index: {}]   ;;  %s988_s2 = inlined_call_operand.vmem [shape: f32[4,1], index: 2, kind: input, shape index: {}]   ;;  %s989_s3 = inlined_call_operand.<no memory space> [shape: f32[1,1], index: 3, kind: input, shape index: {}]   ;;  %s990_s4 = inlined_call_operand.vmem [shape: f32[1,4], index: 4, kind: input, shape index: {}]   ;;  %s991_s5 = inlined_call_operand.vmem [shape: f32[1,4], index: 5, kind: input, shape index: {}]   ;;  %s992_s6 = inlined_call_operand.hbm [shape: f32[2,4,256], index: 6, kind: output, shape index: {}]  }
   0x1   :  { %993 = sst [smem:[#allocation13_spill]] %s986_s0  ;;  %v11_v0 = vstv %s989_s3 }
   0x2   :  { %12 = vst [vmem:[#allocation2] sm:$0x1] %v11_v0 }
   0x3   :  { %13 = vsyncpa [#allocation4], 0 }
   0x4   :  { %15 = vsyncpa [#allocation4 + $0x1], 0 }
   0x5   :  { %16 = vsyncpa [#allocation7], 0 }
   0x6   :  { %18 = vsyncpa [#allocation7 + $0x1], 0 }
   0x7   :  { %19 = vsyncpa [#allocation5], 0 }
   0x8   :  { %21 = vsyncpa [#allocation5 + $0x1], 0  ;;  %s803_s23 = smov 0   ;;  %s805_s24 = smov 0  }
   0x9   :  { %s807_s25 = smov 0   ;;  %s809_s26 = smov 0  }
   0xa LB: > { %s824_s3 = sadd.s32 4294967295, %s762_s26   ;;  %s548_s27 = sadd.s32 4294967294, %s762_s26   ;;  %s762_s26 = sphi %s809_s26, %s1007_s26   ;;  %s758_s25 = sphi %s807_s25, %s1006_s25   ;;  %s754_s24 = sphi %s805_s24, %s1005_s24   ;;  %s750_s23 = sphi %s803_s23, %s1004_s23  }
   0xb   : > { %s828_s28 = sadd.s32 1, %s762_s26   ;;  %s34_s29 = sadd.s32 1, %s758_s25 }
   0xc   : > { %s31_s30 = ssub.s32 %s762_s26, %s828_s28  ;;  %p41_p0 = scmp.ne.s32.totalorder %s758_s25, %s754_s24 }
   0xd   : > { %p32_p1 = scmp.eq.s32.totalorder %s31_s30, 0  ;;  %p42_p2 = scmp.eq.s32.totalorder %s762_s26, 0 }
   0xe   : > { %p47_p3 = scmp.ne.s32.totalorder %s754_s24, %s750_s23  ;;  %p48_p4 = scmp.eq.s32.totalorder %s824_s3, 0 }
   0xf   : > { %s840_s7 = scalar_select %p32_p1, %s758_s25, %s34_s29  }
  0x10   : > { %p842_p5 = por %p42_p2, %p41_p0  ;;  %p846_p6 = por %p48_p4, %p47_p3 }
  0x11   : > { %994 = sst [smem:[#allocation12_spill]] %s840_s7  ;;  %p181_p7 = scmp.eq.s32.totalorder %s824_s3, 1 }
  0x12   : > { %p187_p8 = scmp.eq.s32.totalorder %s548_s27, 1  ;;  %p591_p10 = scmp.lt.s32.totalorder %s762_s26, 2 }
  0x13   : > { %p853_p11 = por %p181_p7, %p41_p0  ;;  %s862_s12 = sand.u32 1, %s758_s25  }
  0x14   : > { %p857_p12 = por %p187_p8, %p47_p3  ;;  %s571_s13 = sshll.u32 %s762_s26, 3 }
  0x15   : > { %s551_s14 = sshll.u32 %s862_s12, 3  ;;  %s999_s0 = sld [smem:[#allocation13_spill]] }
  0x16   : > { %s223_s19 = scalar_lea.vmem [#allocation3], %s551_s14  ;;  %p871_p13 = pnand %p591_p10, %p842_p5 }
  0x17   : > { %s232_s20 = sshll.u32 %s223_s19, 4  ;;  %p557_p0 = scmp.ge.s32.totalorder %s762_s26, 1  ;;  %s233_s20 = int_to_ptr.vmem [resolvable:$true] %s232_s20 }
  0x18   : > { %p257_p1 = scmp.lt.s32.totalorder %s762_s26, 3  ;;  %s220_s22 = scalar_lea.sflag [#allocation4], %s862_s12 }
  0x19   : > { %p636_p3 = pneg %p871_p13 }
  0x1b   : > { %s228_s17 = scalar_lea.hbm %s999_s0, %s571_s13  ;;  %s639_s15 = scalar_lea.hbm %s999_s0, 16 }
  0x1c   : > { %s230_s18 = sshll.u32 %s228_s17, 4  ;;  %s231_s18 = int_to_ptr.hbm [resolvable:$true] %s230_s18 }
  0x1d   : > { %s632_s27 = sshra.s32 %s231_s18, 4  ;;  %s633_s27 = int_to_ptr.hbm [resolvable:$true] %s632_s27 }
  0x1e   : > { %s634_s29 = scalar_lea.hbm %s633_s27, 8  ;;  %p640_p5 = scmp.lt.s32.totalorder %s633_s27, %s999_s0 }
  0x1f   : > { %p635_p2 = scmp.ne.s32.totalorder %s633_s27, %s634_s29  ;;  %p641_p8 = scmp.lt.s32.totalorder %s639_s15, %s634_s29 }
  0x21   : > { %p637_p4 = pnand %p636_p3, %p635_p2  ;;  %p642_p10 = por %p641_p8, %p640_p5 }
  0x23   : > { %p638_p7 = pneg %p637_p4 }
  0x25   : > { %p643_p9 = pnand %p642_p10, %p638_p7 }
  0x27   : > { %646 = shalt.err (!%p643_p9)
}
  0x28   : > { %583 = dma.hbm_to_vmem [thread:$0]  (!%p871_p13), %s231_s18, 128, %s233_s20, %s220_s22  }
  0x29   : > { %p895_p2 = pnand %p557_p0, %p257_p1  ;;  %s248_s27 = scalar_lea.hbm %s987_s1, %s571_s13 }
  0x2a   : > { %s250_s29 = sshll.u32 %s248_s27, 4  ;;  %s243_s15 = scalar_lea.vmem [#allocation6], %s551_s14  ;;  %s251_s29 = int_to_ptr.hbm [resolvable:$true] %s250_s29 }
  0x2b   : > { %s252_s16 = sshll.u32 %s243_s15, 4  ;;  %s240_s17 = scalar_lea.sflag [#allocation7], %s862_s12  ;;  %s253_s16 = int_to_ptr.vmem [resolvable:$true] %s252_s16 }
  0x2c   : > { %s662_s0 = sshra.s32 %s251_s29, 4  ;;  %s669_s22 = scalar_lea.hbm %s987_s1, 16  ;;  %s663_s0 = int_to_ptr.hbm [resolvable:$true] %s662_s0 }
  0x2d   : > { %s664_s7 = scalar_lea.hbm %s663_s0, 8  ;;  %p670_p4 = scmp.lt.s32.totalorder %s663_s0, %s987_s1 }
  0x2e   : > { %p665_p9 = scmp.ne.s32.totalorder %s663_s0, %s664_s7  ;;  %p671_p7 = scmp.lt.s32.totalorder %s669_s22, %s664_s7 }
  0x30   : > { %p667_p0 = pnand %p665_p9, %p636_p3  ;;  %p672_p5 = por %p671_p7, %p670_p4 }
  0x32   : > { %p668_p1 = pneg %p667_p0 }
  0x34   : > { %p673_p8 = pnand %p672_p5, %p668_p1 }
  0x36   : > { %676 = shalt.err (!%p673_p8)
}
  0x37   : > { %586 = dma.hbm_to_vmem [thread:$0]  (!%p871_p13), %s251_s29, 128, %s253_s16, %s240_s17  }
  0x38   : > { %261 = sbr.rel (%p895_p2) target bundleno = 618 (0x26a), region = 44  ;;  %s917_s12 = sand.u32 (!%p895_p2), 1, %s754_s24  }
  0x39   : > { %s920_s14 = sshll.u32 (!%p895_p2), %s917_s12, 3  ;;  %s264_s0 = scalar_lea.sflag (!%p895_p2), [#allocation4], %s917_s12 }
  0x3a   : > { %s267_s7 = scalar_lea.vmem (!%p895_p2), [#allocation3], %s920_s14 }
  0x3d   : > { %737 = dma.done.wait (%p846_p6), %s264_s0, 128  }
  0x3e   : > { %739 = vsyncadd (%p846_p6), %s264_s0, 4294967168  ;;  %s274_s21 = scalar_lea.sflag [#allocation7], %s917_s12  ;;  %s277_s19 = scalar_lea.vmem [#allocation6], %s920_s14 }
  0x3f   : > { %741 = dma.done.wait (%p846_p6), %s274_s21, 128  }
  0x40   : > { %743 = vsyncadd (%p846_p6), %s274_s21, 4294967168  ;;  %v934_v1 = vld [vmem:[%s267_s7] sm:$0xff]  ;;  %v937_v2 = vld [vmem:[%s277_s19] sm:$0xff]  ;;  %vm320_vm0 = vcmask 1043456   ;;  %v342_v15 = vlaneseq  ;;  %vm345_vm1 = vcmask 31744   ;;  %vm378_vm2 = vcmask 1040384  }
  0x41   : > { %315 = vst [vmem:[#allocation1] ss:$2 sm:$0xff] %v934_v1  ;;  %v339_v13 = vld [vmem:[%s988_s2] sm:$0xf]  ;;  %v340_v22 = vld [vmem:[#allocation2] sm:$0x1]  ;;  %v428_v47 = vsub.f32 %v934_v1, %v937_v2 }
  0x42   : > { %561 = vmatpush.msk.msra.mxu0 %vm320_vm0, %v339_v13  ;;  %v343_v17 = vand.u32 127, %v342_v15  ;;  %v372_v21 = vld [vmem:[%s990_s4] sm:$0x1]  ;;  %vm374_vm3 = vcmask 7168   ;;  %v423_v26 = vshrl.u32 %v342_v15, 7  ;;  %s573_s17 = sshll.u32 %s824_s3, 3 }
  0x43   : > { %563 = vmatpush.msk.msra.mxu1 %vm378_vm2, %v372_v21  ;;  %v373_v27 = vld [vmem:[%s991_s5] sm:$0x1]  ;;  %v764_v44 = vmov 839922192   ;;  %s450_s22 = scalar_lea.hbm %s992_s6, %s573_s17  ;;  %s311_s30 = scalar_lea.vmem [#allocation8], %s920_s14 }
  0x44   : > { %626 = vset.pattern.permute.xlu1 %v423_v26  ;;  %627 = vset.pattern.permute.xlu0 %v423_v26  ;;  %v431_v45 = vunpack.c.l.s4 %v764_v44  ;;  %s452_s13 = sshll.u32 %s311_s30, 4  ;;  %s454_s0 = sshll.u32 %s450_s22, 4  ;;  %s453_s13 = int_to_ptr.vmem [resolvable:$true] %s452_s13  ;;  %s455_s0 = int_to_ptr.hbm [resolvable:$true] %s454_s0 }
  0x45   : > { %s439_s3 = scalar_lea.sflag [#allocation5], %s917_s12  ;;  %s706_s7 = sshra.s32 %s455_s0, 4  ;;  %s707_s7 = int_to_ptr.hbm [resolvable:$true] %s706_s7 }
  0x46   : > { %v432_v46 = vunpack.c.0.s8 %v431_v45  ;;  %s708_s21 = scalar_lea.hbm %s707_s7, 8  ;;  %s712_s14 = scalar_lea.hbm %s992_s6, 16 }
  0x47   : > { %p709_p6 = scmp.ne.s32.totalorder %s707_s7, %s708_s21  ;;  %p713_p10 = scmp.lt.s32.totalorder %s707_s7, %s992_s6 }
  0x48   : > { %v316_v3 = vld.sshfl [vmem:[#allocation1] sm:$0xff pattern:$0x75316420]  ;;  %v317_v4 = vld.sshfl [vmem:[#allocation1 + $0x8] sm:$0xff pattern:$0x75316420]  ;;  %p714_p2 = scmp.lt.s32.totalorder %s712_s14, %s708_s21 }
  0x49   : > { %v321_v5 = vsel %vm320_vm0, %v316_v3, 0.0  ;;  %v322_v6 = vsel %vm320_vm0, %v317_v4, 0.0  ;;  %327 = vst [vmem:[#allocation1] ss:$2 sm:$0xff] %v937_v2  ;;  %p710_p13 = pnand %p709_p6, %p853_p11 }
  0x4a   : > { %v323_v7 = vadd.f32 %v322_v6, %v321_v5  ;;  %p715_p9 = por %p714_p2, %p713_p10 }
  0x4b   : > { %p711_p3 = pneg %p710_p13 }
  0x4c   : > { %324 = vadd.xlane.f32.xlu0 %v323_v7 }
  0x4d   : > { %p716_p0 = pnand %p715_p9, %p711_p3 }
  0x50   : > { %v328_v8 = vld.sshfl [vmem:[#allocation1] sm:$0xff pattern:$0x75316420]  ;;  %v329_v9 = vld.sshfl [vmem:[#allocation1 + $0x8] sm:$0xff pattern:$0x75316420] }
  0x51   : > { %v332_v10 = vsel %vm320_vm0, %v328_v8, 0.0  ;;  %v333_v11 = vsel %vm320_vm0, %v329_v9, 0.0 }
  0x52   : > { %v334_v12 = vadd.f32 %v333_v11, %v332_v10 }
  0x54   : > { %335 = vadd.xlane.f32.xlu0 %v334_v12 }
  0xbf   : > { %v325_v14 = vpop.xlane.xlu0 %324 }
  0xc7   : > { %v336_v16 = vpop.xlane.xlu0 %335 }
  0xc8   : > { %v337_v18 = vadd.f32 %v336_v16, %v325_v14 }
  0xca   : > { %v338_v19 = vmul.f32 0.00390625, %v337_v18 }
  0xcc   : > { %v344_v20 = vperm.slane %v338_v19, %v343_v17 }
  0xce   : > { %562 = vmatmul.msk.f32.vlgmr.msra.gmra.mxu0 %vm345_vm1, %v344_v20 }
 0x14b   : > { %v368_v23 = vpop.f32.mrf.mxu0 }
 0x14c   : > { %v369_v24 = vadd.f32 %v368_v23, %v340_v22 }
 0x14e   : > { %v371_v25 = vmax.f32 %v369_v24, 0.0 }
 0x150   : > { %564 = vmatmul.msk.f32.vlgmr.msra.gmra.mxu1 %vm374_vm3, %v371_v25 }
 0x1cd   : > { %v399_v28 = vpop.f32.mrf.mxu1 }
 0x1ce   : > { %v400_v29 = vadd.f32 %v399_v28, %v373_v27 }
 0x1d0   : > { %v565_v30 = vmul.f32 -1.442695, %v400_v29 }
 0x1d2   : > { %628 = vpow2.f32 %v565_v30 }
 0x1d8   : > { %v629_v31 = vpop.eup %628 }
 0x1d9   : > { %v405_v32 = vadd.f32 1.0, %v629_v31 }
 0x1db   : > { %630 = vrcp.f32 %v405_v32  ;;  %v417_v36 = vand.u32 2147483648, %v405_v32  ;;  %v415_v38 = vand.u32 2147483647, %v405_v32  ;;  %vm411_vm5 = vweird.f32 %v405_v32 }
 0x1dd   : > { %v418_v40 = vor.u32 1.1754944e-38, %v417_v36  ;;  %vm416_vm7 = vcmp.eq.f32.partialorder %v415_v38, 8.507059e+37 }
 0x1e1   : > { %v631_v33 = vpop.eup %630 }
 0x1e2   : > { %v407_v34 = vmul.f32 %v631_v33, %v405_v32  ;;  %vm412_vm4 = vweird.f32 %v631_v33 }
 0x1e3   : > { %vm413_vm6 = vmor %vm411_vm5, %vm412_vm4 }
 0x1e4   : > { %v408_v35 = vsub.f32 1.0, %v407_v34 }
 0x1e6   : > { %v409_v37 = vmul.f32 %v631_v33, %v408_v35 }
 0x1e8   : > { %v410_v39 = vadd.f32 %v631_v33, %v409_v37 }
 0x1ea   : > { %v414_v41 = vsel %vm413_vm6, %v631_v33, %v410_v39 }
 0x1eb   : > { %v419_v42 = vsel %vm416_vm7, %v418_v40, %v414_v41 }
 0x1ec   : > { %v421_v43 = vperm.slane %v419_v42, 0 }
 0x1ee   : > { %426 = vperm.xlu1 %626, %v421_v43  }
 0x260   : > { %v427_v48 = vpop.permute.xlu1 %426 }
 0x261   : > { %v433_v49 = vperm.slane %v427_v48, %v432_v46 }
 0x263   : > { %v435_v50 = vmul.f32 %v433_v49, %v428_v47 }
 0x265   : > { %v436_v51 = vadd.f32 %v435_v50, %v937_v2 }
 0x267   : > { %437 = vst [vmem:[%s311_s30] sm:$0xff] %v436_v51 }
 0x268   : > { %719 = shalt.err (!%p716_p0)
}
 0x269   : > { %578 = dma.vmem_to_hbm [thread:$0]  (%p853_p11), %s453_s13, 128, %s455_s0, %s439_s3  }
 0x26a PF: > { %s466_s12 = sand.u32 1, %s750_s23   ;;  %p1002_p1 = scmp.ge.s32.totalorder %s762_s26, 2 }
 0x26b   : > { %s467_s29 = scalar_lea.sflag [#allocation5], %s466_s12 }
 0x26c   : > { %p588_p4 = pnand %p1002_p1, %p857_p12 }
 0x26e   : > { %p589_p7 = pneg %p588_p4 }
 0x270   : > { %745 = dma.done.wait (%p589_p7), %s467_s29, 128  }
 0x271   : > { %747 = vsyncadd (%p589_p7), %s467_s29, 4294967168  ;;  %s1003_s15 = sld [smem:[#allocation12_spill]]  ;;  %p24_p5 = scmp.ge.s32.totalorder %s828_s28, 4  }
 0x272   : > { %s1004_s23 = smov %s754_s24  ;;  %s1005_s24 = smov %s758_s25 }
 0x273   : > { %s1007_s26 = smov %s828_s28  ;;  %26 = sbr.rel (!%p24_p5) target bundleno = 10 (0xa), region = 102 }
 0x277   : > { %s1006_s25 = smov %s1003_s15 }
 0x278   :  { %473 = vsyncpa [#allocation4], 1 }
 0x279   :  { %475 = vsyncpa [#allocation4 + $0x1], 1 }
 0x27a   :  { %476 = vsyncpa [#allocation7], 1 }
 0x27b   :  { %478 = vsyncpa [#allocation7 + $0x1], 1 }
 0x27c   :  { %479 = vsyncpa [#allocation5], 1 }
 0x27d   :  { %481 = vsyncpa [#allocation5 + $0x1], 1 }

</bundles_post_ra>
